<compile_context>
chip_gen: v5e
topology: v5e:2x2
jax: 0.10.0
libtpu: 0.0.40
codegen_flags: <defaults>
</compile_context>

<pallas_src>
import functools

import jax
import jax.numpy as jnp
from jax.experimental import pallas as pl
from jax.experimental.pallas import tpu as pltpu


def _rmsn_kernel(x_ref, o_ref, *, eps):
    # Matches torch: upcast to f32, mean(x^2) over last axis, x * rsqrt(var+eps).
    x = x_ref[...].astype(jnp.float32)
    var = jnp.mean(x * x, axis=-1, keepdims=True)
    y = x * jax.lax.rsqrt(var + eps)
    o_ref[...] = y.astype(o_ref.dtype)


def _rmsn_reference(x, eps):
    xf = x.astype(jnp.float32)
    var = jnp.mean(xf * xf, axis=-1, keepdims=True)
    return (xf * jax.lax.rsqrt(var + eps)).astype(x.dtype)


def _vmem_budget_bytes():
    """~70% of physical VMEM (leaves compiler headroom); conservative fallback."""
    try:
        cap = int(pltpu.get_tpu_info().vmem_capacity_bytes)
    except Exception:
        cap = 64 * 1024 * 1024  # v7x physical VMEM -> safe on every generation
    return int(cap * 0.70)


def rmsn(hidden_states, eps=1e-6, row_tile=None):
    """RMSN forward. Normalizes over the last axis; returns input dtype."""
    orig_shape = hidden_states.shape
    orig_dtype = hidden_states.dtype
    hidden = orig_shape[-1]
    rows = 1
    for d in orig_shape[:-1]:
        rows *= d

    # Non-lane-dense hidden (or degenerate input): masked vst + pallas dispatch
    # overhead exceed the work -> plain XLA with identical math.
    if hidden % 128 != 0 or rows == 0:
        return _rmsn_reference(hidden_states, eps)

    x2d = hidden_states.reshape(rows, hidden)
    itemsize = jnp.dtype(orig_dtype).itemsize

    # Sublane packing alignment: 8 rows (32-bit), 16 (16-bit), 32 (8-bit).
    align = max(8, 32 // itemsize)

    # Per-row VMEM: 2x double-buffered input + 2x output, plus ~3 f32 temps
    # inside the kernel body (upcast, squared, normalized).
    per_row_bytes = hidden * (4 * itemsize + 3 * 4)
    budget = _vmem_budget_bytes()

    if row_tile is None:
        tr = (budget // per_row_bytes) // align * align
        tr = max(align, min(tr, 1024))  # diminishing returns past ~1k rows
    else:
        tr = max(align, (row_tile // align) * align)
    # Never make the tile bigger than the (aligned) row count.
    tr = min(tr, ((rows + align - 1) // align) * align)

    # Pad rows to a tile multiple. Padded rows are zeros: var=0 -> rsqrt(eps) is
    # finite, output rows are zeros and sliced off afterwards.
    padded_rows = ((rows + tr - 1) // tr) * tr
    if padded_rows != rows:
        x2d = jnp.pad(x2d, ((0, padded_rows - rows), (0, 0)))

    grid = (padded_rows // tr,)

    need_bytes = 4 * tr * hidden * itemsize + 3 * tr * hidden * 4
    vmem_limit = max(need_bytes + (4 << 20), 32 << 20)

    out2d = pl.pallas_call(
        functools.partial(_rmsn_kernel, eps=eps),
        out_shape=jax.ShapeDtypeStruct((padded_rows, hidden), orig_dtype),
        grid_spec=pltpu.PrefetchScalarGridSpec(
            num_scalar_prefetch=0,
            grid=grid,
            in_specs=[pl.BlockSpec((tr, hidden), lambda i: (i, 0))],
            out_specs=pl.BlockSpec((tr, hidden), lambda i: (i, 0)),
        ),
        compiler_params=pltpu.CompilerParams(
            dimension_semantics=("parallel",),  # megacore-shards the row axis
            vmem_limit_bytes=int(vmem_limit),
        ),
        cost_estimate=pl.CostEstimate(
            flops=3 * padded_rows * hidden,
            transcendentals=padded_rows,
            bytes_accessed=2 * padded_rows * hidden * itemsize,
        ),
    )(x2d)

    if padded_rows != rows:
        out2d = out2d[:rows]
    return out2d.reshape(orig_shape)


if __name__ == "__main__":
    key = jax.random.PRNGKey(0)
    k1, k2, k3 = jax.random.split(key, 3)
    eps = 1e-6

    # 1) Main Pallas path: lane-dense hidden (multiple of 128), bf16.
    x = jax.random.normal(k1, (2, 8, 128), dtype=jnp.bfloat16)
    out = rmsn(x, eps=eps)
    jax.block_until_ready(out)
    ref = _rmsn_reference(x, eps)
    assert out.shape == x.shape and out.dtype == x.dtype
    assert jnp.allclose(out.astype(jnp.float32), ref.astype(jnp.float32),
                        atol=1e-2, rtol=1e-2)

    # 2) Row-padding path: rows (=15) not a multiple of the aligned row tile.
    x2 = jax.random.normal(k2, (3, 5, 128), dtype=jnp.float32)
    out2 = rmsn(x2, eps=eps)
    jax.block_until_ready(out2)
    ref2 = _rmsn_reference(x2, eps)
    assert out2.shape == x2.shape and out2.dtype == x2.dtype
    assert jnp.allclose(out2, ref2, atol=1e-5, rtol=1e-5)

    # 3) Tiny-hidden path (hidden=32): intentionally bypasses Pallas (plain XLA).
    x3 = jax.random.normal(k3, (2, 8, 32), dtype=jnp.bfloat16)
    out3 = rmsn(x3, eps=eps)
    jax.block_until_ready(out3)
    ref3 = _rmsn_reference(x3, eps)
    assert out3.shape == x3.shape and out3.dtype == x3.dtype
    assert jnp.allclose(out3.astype(jnp.float32), ref3.astype(jnp.float32),
                        atol=1e-2, rtol=1e-2)

    print("KERNEL_OK")
</pallas_src>

<mosaic_0001>
module attributes {stable_mosaic.version = 11 : i64} {
  func.func @_rmsn_kernel(%arg0: i32, %arg1: memref<16x128xbf16, #tpu.memory_space<vmem>>, %arg2: memref<16x128xbf16, #tpu.memory_space<vmem>>) attributes {dimension_semantics = [#tpu.dimension_semantics<parallel>], iteration_bounds = array<i64: 1>, scalar_prefetch = 0 : i64, scratch_operands = 0 : i64, tpu.core_type = #tpu.core_type<tc>, window_params = [{transform_indices = @transform_0, window_bounds = array<i64: 16, 128>}, {transform_indices = @transform_1, window_bounds = array<i64: 16, 128>}]} {
    %c0 = arith.constant 0 : index
    %c0_0 = arith.constant 0 : index
    %0 = vector.load %arg1[%c0, %c0_0] : memref<16x128xbf16, #tpu.memory_space<vmem>>, vector<16x128xbf16>
    %1 = arith.extf %0 : vector<16x128xbf16> to vector<16x128xf32>
    %2 = arith.mulf %1, %1 : vector<16x128xf32>
    %cst = arith.constant dense<0.000000e+00> : vector<16xf32>
    %3 = vector.multi_reduction <add>, %2, %cst [1] : vector<16x128xf32> to vector<16xf32>
    %4 = vector.shape_cast %3 : vector<16xf32> to vector<16x1xf32>
    %cst_1 = arith.constant 1.280000e+02 : f32
    %5 = vector.broadcast %cst_1 : f32 to vector<16x1xf32>
    %6 = arith.divf %4, %5 : vector<16x1xf32>
    %cst_2 = arith.constant 9.99999997E-7 : f32
    %7 = vector.broadcast %cst_2 : f32 to vector<16x1xf32>
    %8 = arith.addf %6, %7 : vector<16x1xf32>
    %9 = math.rsqrt %8 : vector<16x1xf32>
    %10 = vector.broadcast %9 : vector<16x1xf32> to vector<16x128xf32>
    %11 = arith.mulf %1, %10 : vector<16x128xf32>
    %12 = arith.truncf %11 : vector<16x128xf32> to vector<16x128xbf16>
    %c0_3 = arith.constant 0 : index
    %c0_4 = arith.constant 0 : index
    %13 = vector.load %arg2[%c0_3, %c0_4] : memref<16x128xbf16, #tpu.memory_space<vmem>>, vector<16x128xbf16>
    tpu.vector_store %arg2[%c0_3, %c0_4], %12 {strides = array<i32>} : memref<16x128xbf16, #tpu.memory_space<vmem>>, vector<16x128xbf16>,
    return
  }
  func.func @transform_0(%arg0: i32) -> (i32, i32) {
    %c0_i32 = arith.constant 0 : i32
    %c0_i32_0 = arith.constant 0 : i32
    return %arg0, %c0_i32 : i32, i32
  }
  func.func @transform_1(%arg0: i32) -> (i32, i32) {
    %c0_i32 = arith.constant 0 : i32
    %c0_i32_0 = arith.constant 0 : i32
    return %arg0, %c0_i32 : i32, i32
  }
}

</mosaic_0001>

<bundles_post_ra>
// kernel: tpu_custom_call.1
= control target key start
LH: loop header
LB: loop body
LE: loop exit
PB: predicated region body
PF: predicated region fallthrough
CT: control target
= control target key end

     0   :  { %6 = vsyncpa [#allocation3], 0  ;;  %s190_s0 = inlined_call_operand.hbm [shape: bf16[16,128], index: 0, kind: input, shape index: {}]   ;;  %s191_s1 = inlined_call_operand.hbm [shape: bf16[16,128], index: 1, kind: output, shape index: {}]  }
   0x1   :  { %7 = vsyncpa [#allocation4], 0  ;;  %s12_s8 = sshll.u32 %s190_s0, 4  ;;  %s163_s9 = smov [#allocation2]   ;;  %s13_s8 = int_to_ptr.hbm [resolvable:$true] %s12_s8 }
   0x2   :  { %s14_s10 = sshll.u32 %s163_s9, 4  ;;  %s164_s11 = smov 64   ;;  %s15_s10 = int_to_ptr.vmem [resolvable:$true] %s14_s10 }
   0x3   :  { %s165_s12 = smov 4  }
   0x4   :  { %20 = dma.hbm_to_vmem [thread:$0]  %s13_s8, 128, %s15_s10, [#allocation3], %s164_s11, %s164_s11, %s165_s12  }
   0x5   :  { %159 = dma.done.wait [#allocation3], 128  }
   0x6   :  { %160 = vsyncadd [#allocation3], 4294967168  ;;  %v92_v0 = vld [vmem:[#allocation2] sm:$0xff]   ;;  %v166_v5 = vmov 128.0   ;;  %s167_s0 = smov [#allocation5]   ;;  %s78_s16 = sshll.u32 %s191_s1, 4  ;;  %s79_s16 = int_to_ptr.hbm [resolvable:$true] %s78_s16 }
   0x7   :  { %v93_v1 = vunpack.c.l.bf16 %v92_v0  ;;  %v94_v3 = vunpack.c.h.bf16 %v92_v0  ;;  %105 = vrcp.f32 %v166_v5  ;;  %s76_s13 = sshll.u32 %s167_s0, 4  ;;  %s77_s13 = int_to_ptr.vmem [resolvable:$true] %s76_s13 }
   0x9   :  { %v29_v2 = vmul.f32 %v93_v1, %v93_v1  ;;  %v30_v4 = vmul.f32 %v94_v3, %v94_v3 }
   0xb   :  { %31 = vadd.xlane.f32.xlu0 %v29_v2 }
   0xd   :  { %v106_v6 = vpop.eup %105 }
   0xe   :  { %v36_v7 = vmul.f32 128.0, %v106_v6  ;;  %vm40_vm0 = vweird.f32 %v106_v6 }
  0x10   :  { %v37_v8 = vsub.f32 1.0, %v36_v7 }
  0x12   :  { %v38_v9 = vmul.f32 %v106_v6, %v37_v8 }
  0x13   :  { %33 = vadd.xlane.f32.xlu0 %v30_v4 }
  0x14   :  { %v39_v10 = vadd.f32 %v106_v6, %v38_v9 }
  0x16   :  { %v41_v11 = vsel %vm40_vm0, %v106_v6, %v39_v10 }
  0x7e   :  { %v32_v12 = vpop.xlane.xlu0 %31 }
  0x7f   :  { %v42_v13 = vmul.f32 %v41_v11, %v32_v12 }
  0x81   :  { %v44_v14 = vadd.f32 1e-06, %v42_v13 }
  0x83   :  { %107 = vrsqrt.f32 %v44_v14  ;;  %vm52_vm2 = vweird.f32 %v44_v14 }
  0x86   :  { %v34_v15 = vpop.xlane.xlu0 %33 }
  0x87   :  { %v43_v16 = vmul.f32 %v41_v11, %v34_v15 }
  0x89   :  { %v108_v17 = vpop.eup %107  ;;  %v45_v18 = vadd.f32 1e-06, %v43_v16 }
  0x8a   :  { %v47_v19 = vmul.f32 %v108_v17, %v44_v14  ;;  %vm53_vm1 = vweird.f32 %v108_v17 }
  0x8b   :  { %109 = vrsqrt.f32 %v45_v18  ;;  %vm54_vm4 = vmor %vm52_vm2, %vm53_vm1  ;;  %vm62_vm5 = vweird.f32 %v45_v18 }
  0x8c   :  { %v48_v20 = vmul.f32 %v108_v17, %v47_v19 }
  0x8e   :  { %v49_v21 = vmul.f32 0.5, %v48_v20 }
  0x90   :  { %v50_v23 = vsub.f32 1.5, %v49_v21 }
  0x91   :  { %v110_v22 = vpop.eup %109 }
  0x92   :  { %v57_v24 = vmul.f32 %v110_v22, %v45_v18  ;;  %v51_v26 = vmul.f32 %v108_v17, %v50_v23  ;;  %vm63_vm3 = vweird.f32 %v110_v22 }
  0x93   :  { %vm64_vm6 = vmor %vm62_vm5, %vm63_vm3 }
  0x94   :  { %v58_v25 = vmul.f32 %v110_v22, %v57_v24  ;;  %v55_v30 = vsel %vm54_vm4, %v108_v17, %v51_v26 }
  0x95   :  { %v66_v32 = vmul.f32 %v93_v1, %v55_v30 }
  0x96   :  { %v59_v27 = vmul.f32 0.5, %v58_v25 }
  0x98   :  { %v60_v28 = vsub.f32 1.5, %v59_v27 }
  0x9a   :  { %v61_v29 = vmul.f32 %v110_v22, %v60_v28 }
  0x9c   :  { %v65_v31 = vsel %vm64_vm6, %v110_v22, %v61_v29 }
  0x9d   :  { %v67_v33 = vmul.f32 %v94_v3, %v65_v31 }
  0x9f   :  { %v98_v34 = vpack.c.bf16 %v67_v33, %v66_v32 }
  0xa1   :  { %99 = vst [vmem:[#allocation5] sm:$0xff] %v98_v34  }
  0xa2   :  { %84 = dma.vmem_to_hbm [thread:$0]  %s77_s13, 128, %s79_s16, [#allocation4], %s164_s11, %s164_s11, %s165_s12  }
  0xa3   :  { %161 = dma.done.wait [#allocation4], 128  }
  0xa4   :  { %162 = vsyncadd [#allocation4], 4294967168 }
  0xa5   :  { %89 = vsyncpa [#allocation3], 1 }
  0xa6   :  { %90 = vsyncpa [#allocation4], 1 }

</bundles_post_ra>
